<compile_context>
chip_gen: v5e
topology: v5e:2x2
jax: 0.10.0
libtpu: 0.0.40
codegen_flags: <defaults>
</compile_context>

<pallas_src>
import jax
import jax.numpy as jnp
from jax.experimental import pallas as pl
from jax.experimental.pallas import tpu as pltpu

_MIB = 1024 * 1024


def _round_up(x, m):
    return (x + m - 1) // m * m


def _cdiv(a, b):
    return (a + b - 1) // b


def _vmem_capacity_bytes():
    try:
        return int(pltpu.get_tpu_info().vmem_capacity_bytes)
    except Exception:
        return 64 * _MIB  # conservative default (v7x per-TensorCore VMEM)


def _mlp_kernel(x_ref, w1_ref, b1_ref, w2_ref, b2_ref, o_ref, acc_ref):
    k = pl.program_id(1)

    @pl.when(k == 0)
    def _init():
        acc_ref[...] = jnp.zeros_like(acc_ref)

    # Layer 1: (tm, D_in) @ (D_in, th) on the MXU with f32 accumulation,
    # fused bias add + ReLU on the VPU.
    h = jnp.dot(x_ref[...], w1_ref[...], preferred_element_type=jnp.float32)
    h = jnp.maximum(h + b1_ref[...], 0.0)

    # Layer 2 partial product for this hidden chunk.  Feed the MXU in the
    # weight dtype (bf16 weights -> full-rate bf16 pass); f32 accumulation.
    acc_ref[...] += jnp.dot(h.astype(w2_ref.dtype), w2_ref[...],
                            preferred_element_type=jnp.float32)

    @pl.when(k == pl.num_programs(1) - 1)
    def _finalize():
        o_ref[...] = (acc_ref[...] + b2_ref[...]).astype(o_ref.dtype)


def make_mlp(w1, b1, w2, b2, *, weight_dtype=None):
    """Builds fn(x) = relu(x @ w1 + b1) @ w2 + b2 as a fused Pallas kernel.

    Parameters are padded (and optionally cast, e.g. bf16 on v5e) once here,
    so the per-call hot path only touches x and the output.
    """
    if weight_dtype is not None:
        w1 = w1.astype(weight_dtype)
        w2 = w2.astype(weight_dtype)

    D_in, D_hid = w1.shape
    D_out = w2.shape[1]
    w_isz = jnp.dtype(w1.dtype).itemsize

    # Lane-dense padding of all feature dims to multiples of 128.  Zero
    # padding is exact: padded x-cols x padded w1-rows contribute 0, padded
    # hidden units are 0 after bias(0)+ReLU, padded output cols are sliced.
    D_in_p = _round_up(D_in, 128)
    D_hid_p = _round_up(D_hid, 128)
    D_out_p = _round_up(D_out, 128)

    vmem_cap = _vmem_capacity_bytes()
    # Usable budget: leave >=12 MiB headroom for compiler-internal scratch;
    # ~52 MiB on v7x (64 MiB VMEM), ~110 MiB on v5e/v6e (128 MiB VMEM).
    budget = max(min(vmem_cap - 12 * _MIB, 110 * _MIB), 16 * _MIB)
    tm_cap = 512 if vmem_cap >= 96 * _MIB else 256

    def weight_bytes(th, nbuf):
        # w1 chunk + w2 chunk + b1 chunk (per buffer) + resident f32 b2.
        return (nbuf * ((D_in_p * th + th * D_out_p) * w_isz + th * 4)
                + D_out_p * 4)

    # Hidden-dim tiling decision: keep weights fully resident (single
    # buffered) if they fit in ~1/3 of the budget, otherwise stream
    # double-buffered chunks sized to ~1/2 of the budget.
    if weight_bytes(D_hid_p, 1) <= budget // 3:
        th = D_hid_p
    else:
        per_row = 2 * ((D_in_p + D_out_p) * w_isz + 4)  # double-buffered
        th = max(128, ((budget // 2) // per_row) // 128 * 128)
        th = min(th, D_hid_p)
    n_hid = _cdiv(D_hid_p, th)
    D_hid_p = th * n_hid  # pad hidden dim to a whole number of chunks
    resident = n_hid == 1

    # Pad parameters ONCE at construction time (no per-call HBM pass).
    w1_p = w1 if w1.shape == (D_in_p, D_hid_p) else (
        jnp.zeros((D_in_p, D_hid_p), w1.dtype).at[:D_in, :D_hid].set(w1))
    w2_p = w2 if w2.shape == (D_hid_p, D_out_p) else (
        jnp.zeros((D_hid_p, D_out_p), w2.dtype).at[:D_hid, :D_out].set(w2))
    b1_p = jnp.zeros((1, D_hid_p), jnp.float32).at[0, :D_hid].set(
        b1.astype(jnp.float32))
    b2_p = jnp.zeros((1, D_out_p), jnp.float32).at[0, :D_out].set(
        b2.astype(jnp.float32))

    def forward(x):
        B = x.shape[0]
        x_isz = jnp.dtype(x.dtype).itemsize
        w_nbuf = 1 if resident else 2
        wbytes = weight_bytes(th, w_nbuf)

        def act_bytes(tm):
            return (2 * tm * D_in_p * x_isz        # double-buffered x tiles
                    + 2 * tm * D_out_p * x_isz     # double-buffered out tiles
                    + tm * D_out_p * 4             # f32 accumulator scratch
                    + tm * th * 4                  # f32 hidden intermediate
                    + tm * th * w_isz              # layer-2 LHS cast copy
                    + tm * D_out_p * 4)            # layer-2 partial product

        cands = [c for c in (512, 256, 128, 64, 32, 16, 8)
                 if c <= tm_cap and wbytes + act_bytes(c) <= budget]
        if not cands:
            cands = [8]
        # Minimize padded batch rows; tie-break to the largest tile
        # (fewest grid steps / best per-tile HBM efficiency).
        tm = min(cands, key=lambda c: (_round_up(B, c) - B, -c))
        B_p = _round_up(B, tm)
        n_bsteps = B_p // tm
        # TODO(synk): on v7x with a 1-2 step batch grid, add a second
        # "parallel" axis over D_out so both TensorCores get work.

        x_p = x if (B_p == B and D_in_p == D_in) else (
            jnp.zeros((B_p, D_in_p), x.dtype).at[:B, :D_in].set(x))

        flops = 2 * B_p * D_hid_p * (D_in_p + D_out_p)
        w_reads = 1 if resident else n_bsteps
        bytes_accessed = (
            B_p * D_in_p * x_isz
            + w_reads * (D_in_p * D_hid_p + D_hid_p * D_out_p) * w_isz
            + (D_hid_p + D_out_p) * 4
            + B_p * D_out_p * x_isz)

        single_buf = dict(pipeline_mode=pl.Buffered(1))
        # Weights/b1 are single-buffered only when their block index is
        # constant (fully resident); streamed chunks keep default buffering.
        w_mode = single_buf if resident else {}

        out_p = pl.pallas_call(
            _mlp_kernel,
            out_shape=jax.ShapeDtypeStruct((B_p, D_out_p), x.dtype),
            grid_spec=pltpu.PrefetchScalarGridSpec(
                num_scalar_prefetch=0,
                grid=(n_bsteps, n_hid),
                in_specs=[
                    pl.BlockSpec((tm, D_in_p), lambda i, k: (i, 0)),
                    pl.BlockSpec((D_in_p, th), lambda i, k: (0, k), **w_mode),
                    pl.BlockSpec((1, th), lambda i, k: (0, k), **w_mode),
                    pl.BlockSpec((th, D_out_p), lambda i, k: (k, 0), **w_mode),
                    pl.BlockSpec((1, D_out_p), lambda i, k: (0, 0),
                                 **single_buf),
                ],
                out_specs=pl.BlockSpec((tm, D_out_p), lambda i, k: (i, 0)),
                scratch_shapes=[pltpu.VMEM((tm, D_out_p), jnp.float32)],
            ),
            compiler_params=pltpu.CompilerParams(
                dimension_semantics=("parallel", "arbitrary"),
                vmem_limit_bytes=int(budget),
            ),
            cost_estimate=pl.CostEstimate(
                flops=flops, transcendentals=0,
                bytes_accessed=bytes_accessed),
        )(x_p, w1_p, b1_p, w2_p, b2_p)

        if B_p == B and D_out_p == D_out:
            return out_p
        return out_p[:B, :D_out]

    return forward


def mlp_reference(x, w1, b1, w2, b2):
    h = jnp.maximum(x @ w1 + b1, 0.0)
    return h @ w2 + b2


if __name__ == "__main__":
    # Shapes consistent with MLP(input_dim, output_dim): hidden = input_dim // 2.
    batch = 8
    input_dim = 32
    hidden_dim = input_dim // 2   # 16
    output_dim = 8

    key = jax.random.PRNGKey(0)
    kx, k1, kb1, k2, kb2 = jax.random.split(key, 5)

    x = jax.random.normal(kx, (batch, input_dim), dtype=jnp.float32)
    # Deterministic synthetic parameters (no checkpoint load).
    w1 = jax.random.normal(k1, (input_dim, hidden_dim), dtype=jnp.float32) * 0.1
    b1 = jax.random.normal(kb1, (hidden_dim,), dtype=jnp.float32) * 0.1
    w2 = jax.random.normal(k2, (hidden_dim, output_dim), dtype=jnp.float32) * 0.1
    b2 = jax.random.normal(kb2, (output_dim,), dtype=jnp.float32) * 0.1

    mlp = make_mlp(w1, b1, w2, b2)
    out = jax.block_until_ready(mlp(x))

    ref = mlp_reference(x, w1, b1, w2, b2)
    assert out.shape == (batch, output_dim)
    assert jnp.allclose(out, ref, atol=1e-5, rtol=1e-5)

    print("KERNEL_OK")
</pallas_src>

<mosaic_0001>
module attributes {stable_mosaic.version = 11 : i64} {
  func.func @_mlp_kernel(%arg0: i32, %arg1: i32, %arg2: memref<8x128xf32, #tpu.memory_space<vmem>>, %arg3: memref<128x128xf32, #tpu.memory_space<vmem>>, %arg4: memref<1x128xf32, #tpu.memory_space<vmem>>, %arg5: memref<128x128xf32, #tpu.memory_space<vmem>>, %arg6: memref<1x128xf32, #tpu.memory_space<vmem>>, %arg7: memref<8x128xf32, #tpu.memory_space<vmem>>, %arg8: memref<8x128xf32, #tpu.memory_space<vmem>>) attributes {dimension_semantics = [#tpu.dimension_semantics<parallel>, #tpu.dimension_semantics<arbitrary>], iteration_bounds = array<i64: 1, 1>, scalar_prefetch = 0 : i64, scratch_operands = 1 : i64, tpu.core_type = #tpu.core_type<tc>, window_params = [{transform_indices = @transform_0, window_bounds = array<i64: 8, 128>}, {pipeline_mode = #tpu.pipeline_mode<synchronous>, transform_indices = @transform_1, window_bounds = array<i64: 128, 128>}, {pipeline_mode = #tpu.pipeline_mode<synchronous>, transform_indices = @transform_2, window_bounds = array<i64: 1, 128>}, {pipeline_mode = #tpu.pipeline_mode<synchronous>, transform_indices = @transform_3, window_bounds = array<i64: 128, 128>}, {pipeline_mode = #tpu.pipeline_mode<synchronous>, transform_indices = @transform_4, window_bounds = array<i64: 1, 128>}, {transform_indices = @transform_5, window_bounds = array<i64: 8, 128>}]} {
    %c0_i32 = arith.constant 0 : i32
    %0 = arith.cmpi eq, %arg1, %c0_i32 : i32
    %1 = arith.extui %0 : i1 to i32
    %c0_i32_0 = arith.constant 0 : i32
    %2 = arith.cmpi ne, %1, %c0_i32_0 : i32
    scf.if %2 {
      %cst_16 = arith.constant 0.000000e+00 : f32
      %19 = vector.broadcast %cst_16 : f32 to vector<8x128xf32>
      %c0_17 = arith.constant 0 : index
      %c0_18 = arith.constant 0 : index
      %20 = vector.load %arg8[%c0_17, %c0_18] : memref<8x128xf32, #tpu.memory_space<vmem>>, vector<8x128xf32>
      tpu.vector_store %arg8[%c0_17, %c0_18], %19 {strides = array<i32>} : memref<8x128xf32, #tpu.memory_space<vmem>>, vector<8x128xf32>,
    } else {
    }
    %c0 = arith.constant 0 : index
    %c0_1 = arith.constant 0 : index
    %3 = vector.load %arg2[%c0, %c0_1] : memref<8x128xf32, #tpu.memory_space<vmem>>, vector<8x128xf32>
    %c0_2 = arith.constant 0 : index
    %c0_3 = arith.constant 0 : index
    %4 = vector.load %arg3[%c0_2, %c0_3] : memref<128x128xf32, #tpu.memory_space<vmem>>, vector<128x128xf32>
    %cst = arith.constant dense<0.000000e+00> : vector<8x128xf32>
    %5 = tpu.matmul %3, %4, %cst {dimension_numbers = #tpu.dot_dimension_numbers<[1], [0], [0], [1], [0, 0, 1, 1], [], []>} : vector<8x128xf32>, vector<128x128xf32>, vector<8x128xf32> -> vector<8x128xf32>
    %c0_4 = arith.constant 0 : index
    %c0_5 = arith.constant 0 : index
    %6 = vector.load %arg4[%c0_4, %c0_5] : memref<1x128xf32, #tpu.memory_space<vmem>>, vector<1x128xf32>
    %7 = vector.broadcast %6 : vector<1x128xf32> to vector<8x128xf32>
    %8 = arith.addf %5, %7 : vector<8x128xf32>
    %cst_6 = arith.constant 0.000000e+00 : f32
    %9 = vector.broadcast %cst_6 : f32 to vector<8x128xf32>
    %10 = arith.maximumf %8, %9 : vector<8x128xf32>
    %c0_7 = arith.constant 0 : index
    %c0_8 = arith.constant 0 : index
    %11 = vector.load %arg8[%c0_7, %c0_8] : memref<8x128xf32, #tpu.memory_space<vmem>>, vector<8x128xf32>
    %c0_9 = arith.constant 0 : index
    %c0_10 = arith.constant 0 : index
    %12 = vector.load %arg5[%c0_9, %c0_10] : memref<128x128xf32, #tpu.memory_space<vmem>>, vector<128x128xf32>
    %cst_11 = arith.constant dense<0.000000e+00> : vector<8x128xf32>
    %13 = tpu.matmul %10, %12, %cst_11 {dimension_numbers = #tpu.dot_dimension_numbers<[1], [0], [0], [1], [0, 0, 1, 1], [], []>} : vector<8x128xf32>, vector<128x128xf32>, vector<8x128xf32> -> vector<8x128xf32>
    %14 = arith.addf %11, %13 : vector<8x128xf32>
    %c0_12 = arith.constant 0 : index
    %c0_13 = arith.constant 0 : index
    %15 = vector.load %arg8[%c0_12, %c0_13] : memref<8x128xf32, #tpu.memory_space<vmem>>, vector<8x128xf32>
    tpu.vector_store %arg8[%c0_12, %c0_13], %14 {strides = array<i32>} : memref<8x128xf32, #tpu.memory_space<vmem>>, vector<8x128xf32>,
    %c0_i32_14 = arith.constant 0 : i32
    %16 = arith.cmpi eq, %arg1, %c0_i32_14 : i32
    %17 = arith.extui %16 : i1 to i32
    %c0_i32_15 = arith.constant 0 : i32
    %18 = arith.cmpi ne, %17, %c0_i32_15 : i32
    scf.if %18 {
      %c0_16 = arith.constant 0 : index
      %c0_17 = arith.constant 0 : index
      %19 = vector.load %arg8[%c0_16, %c0_17] : memref<8x128xf32, #tpu.memory_space<vmem>>, vector<8x128xf32>
      %c0_18 = arith.constant 0 : index
      %c0_19 = arith.constant 0 : index
      %20 = vector.load %arg6[%c0_18, %c0_19] : memref<1x128xf32, #tpu.memory_space<vmem>>, vector<1x128xf32>
      %21 = vector.broadcast %20 : vector<1x128xf32> to vector<8x128xf32>
      %22 = arith.addf %19, %21 : vector<8x128xf32>
      %c0_20 = arith.constant 0 : index
      %c0_21 = arith.constant 0 : index
      %23 = vector.load %arg7[%c0_20, %c0_21] : memref<8x128xf32, #tpu.memory_space<vmem>>, vector<8x128xf32>
      tpu.vector_store %arg7[%c0_20, %c0_21], %22 {strides = array<i32>} : memref<8x128xf32, #tpu.memory_space<vmem>>, vector<8x128xf32>,
    } else {
    }
    return
  }
  func.func @transform_0(%arg0: i32, %arg1: i32) -> (i32, i32) {
    %c0_i32 = arith.constant 0 : i32
    %c0_i32_0 = arith.constant 0 : i32
    return %arg0, %c0_i32 : i32, i32
  }
  func.func @transform_1(%arg0: i32, %arg1: i32) -> (i32, i32) {
    %c0_i32 = arith.constant 0 : i32
    %c0_i32_0 = arith.constant 0 : i32
    return %c0_i32, %arg1 : i32, i32
  }
  func.func @transform_2(%arg0: i32, %arg1: i32) -> (i32, i32) {
    %c0_i32 = arith.constant 0 : i32
    %c0_i32_0 = arith.constant 0 : i32
    return %c0_i32, %arg1 : i32, i32
  }
  func.func @transform_3(%arg0: i32, %arg1: i32) -> (i32, i32) {
    %c0_i32 = arith.constant 0 : i32
    %c0_i32_0 = arith.constant 0 : i32
    return %arg1, %c0_i32 : i32, i32
  }
  func.func @transform_4(%arg0: i32, %arg1: i32) -> (i32, i32) {
    %c0_i32 = arith.constant 0 : i32
    %c0_i32_0 = arith.constant 0 : i32
    %c0_i32_1 = arith.constant 0 : i32
    return %c0_i32, %c0_i32_0 : i32, i32
  }
  func.func @transform_5(%arg0: i32, %arg1: i32) -> (i32, i32) {
    %c0_i32 = arith.constant 0 : i32
    %c0_i32_0 = arith.constant 0 : i32
    return %arg0, %c0_i32 : i32, i32
  }
}

</mosaic_0001>

<bundles_post_ra>
// kernel: tpu_custom_call.1
= control target key start
LH: loop header
LB: loop body
LE: loop exit
PB: predicated region body
PF: predicated region fallthrough
CT: control target
= control target key end

     0   :  { %10 = vsyncpa [#allocation4], 0  ;;  %s344_s0 = inlined_call_operand.hbm [shape: f32[8,128], index: 0, kind: input, shape index: {}]   ;;  %s345_s1 = inlined_call_operand.hbm [shape: f32[128,128], index: 1, kind: input, shape index: {}]   ;;  %s346_s2 = inlined_call_operand.vmem [shape: f32[1,128], index: 2, kind: input, shape index: {}]   ;;  %s347_s3 = inlined_call_operand.hbm [shape: f32[128,128], index: 3, kind: input, shape index: {}]   ;;  %s348_s4 = inlined_call_operand.vmem [shape: f32[1,128], index: 4, kind: input, shape index: {}]   ;;  %s349_s5 = inlined_call_operand.hbm [shape: f32[8,128], index: 5, kind: output, shape index: {}]  }
   0x1   :  { %11 = vsyncpa [#allocation7], 0  ;;  %s28_s20 = sshll.u32 %s345_s1, 4  ;;  %s29_s20 = int_to_ptr.hbm [resolvable:$true] %s28_s20 }
   0x2   :  { %12 = vsyncpa [#allocation5], 0  ;;  %s290_s21 = smov [#allocation6]   ;;  %s18_s25 = sshll.u32 %s344_s0, 4  ;;  %s19_s25 = int_to_ptr.hbm [resolvable:$true] %s18_s25 }
   0x3   :  { %s30_s22 = sshll.u32 %s290_s21, 4  ;;  %s291_s26 = smov 128   ;;  %s31_s22 = int_to_ptr.vmem [resolvable:$true] %s30_s22 }
   0x4   :  { %s292_s27 = smov 8   ;;  %s293_s28 = smov [#allocation3]  }
   0x5   :  { %36 = dma.hbm_to_vmem [thread:$0]  %s29_s20, 2048, %s31_s22, [#allocation7], %s291_s26, %s291_s26, %s292_s27  }
   0x6   :  { %s20_s29 = sshll.u32 %s293_s28, 4  ;;  %s43_s7 = sshll.u32 %s347_s3, 4  ;;  %s21_s29 = int_to_ptr.vmem [resolvable:$true] %s20_s29  ;;  %s44_s7 = int_to_ptr.hbm [resolvable:$true] %s43_s7 }
   0x7   :  { %23 = dma.hbm_to_vmem [thread:$0]  %s19_s25, 128, %s21_s29, [#allocation4]  }
   0x8   :  { %s294_s1 = smov [#allocation8]  }
   0x9   :  { %s45_s8 = sshll.u32 %s294_s1, 4  ;;  %s46_s8 = int_to_ptr.vmem [resolvable:$true] %s45_s8 }
   0xa   :  { %51 = dma.hbm_to_vmem [thread:$0]  %s44_s7, 2048, %s46_s8, [#allocation7], %s291_s26, %s291_s26, %s292_s27  }
   0xb   :  { %284 = dma.done.wait [#allocation4], 128  }
   0xc   :  { %285 = vsyncadd [#allocation4], 4294967168 }
   0xd   :  { %286 = dma.done.wait [#allocation7], 4096  }
   0xe   :  { %287 = vsyncadd [#allocation7], 4294963200  ;;  %v87_v0 = vld [vmem:[#allocation6 + $0x78] sm:$0xff]  ;;  %v86_v1 = vld [vmem:[#allocation6 + $0x70] sm:$0xff]  ;;  %s295_s11 = smov [#allocation9]   ;;  %s169_s15 = sshll.u32 %s349_s5, 4  ;;  %s170_s15 = int_to_ptr.hbm [resolvable:$true] %s169_s15 }
   0xf   :  { %92 = vmatpush.msra.mxu0 %v87_v0  ;;  %v85_v2 = vld [vmem:[#allocation6 + $0x68] sm:$0xff]  ;;  %v84_v3 = vld [vmem:[#allocation6 + $0x60] sm:$0xff]  ;;  %v129_v4 = vld [vmem:[#allocation8 + $0x78] sm:$0xff]  ;;  %s167_s12 = sshll.u32 %s295_s11, 4  ;;  %s168_s12 = int_to_ptr.vmem [resolvable:$true] %s167_s12 }
  0x10   :  { %v83_v5 = vld [vmem:[#allocation6 + $0x58] sm:$0xff]  ;;  %130 = vmatpush.msra.mxu1 %v129_v4  ;;  %v128_v6 = vld [vmem:[#allocation8 + $0x70] sm:$0xff]  ;;  %v127_v7 = vld [vmem:[#allocation8 + $0x68] sm:$0xff] }
  0x11   :  { %93 = vmatpush.msra.mxu0 %v86_v1  ;;  %v82_v8 = vld [vmem:[#allocation6 + $0x50] sm:$0xff]  ;;  %v126_v9 = vld [vmem:[#allocation8 + $0x60] sm:$0xff]  ;;  %v81_v10 = vld [vmem:[#allocation6 + $0x48] sm:$0xff] }
  0x12   :  { %131 = vmatpush.msra.mxu1 %v128_v6  ;;  %v125_v11 = vld [vmem:[#allocation8 + $0x58] sm:$0xff]  ;;  %v80_v12 = vld [vmem:[#allocation6 + $0x40] sm:$0xff]  ;;  %v124_v13 = vld [vmem:[#allocation8 + $0x50] sm:$0xff] }
  0x13   :  { %94 = vmatpush.msra.mxu0 %v85_v2  ;;  %v79_v14 = vld [vmem:[#allocation6 + $0x38] sm:$0xff]  ;;  %v123_v15 = vld [vmem:[#allocation8 + $0x48] sm:$0xff]  ;;  %v78_v16 = vld [vmem:[#allocation6 + $0x30] sm:$0xff] }
  0x14   :  { %132 = vmatpush.msra.mxu1 %v127_v7  ;;  %v122_v17 = vld [vmem:[#allocation8 + $0x40] sm:$0xff]  ;;  %v77_v18 = vld [vmem:[#allocation6 + $0x28] sm:$0xff]  ;;  %v121_v19 = vld [vmem:[#allocation8 + $0x38] sm:$0xff] }
  0x15   :  { %95 = vmatpush.msra.mxu0 %v84_v3  ;;  %v76_v20 = vld [vmem:[#allocation6 + $0x20] sm:$0xff]  ;;  %v120_v21 = vld [vmem:[#allocation8 + $0x30] sm:$0xff]  ;;  %v75_v22 = vld [vmem:[#allocation6 + $0x18] sm:$0xff] }
  0x16   :  { %133 = vmatpush.msra.mxu1 %v126_v9  ;;  %v119_v23 = vld [vmem:[#allocation8 + $0x28] sm:$0xff]  ;;  %v74_v24 = vld [vmem:[#allocation6 + $0x10] sm:$0xff]  ;;  %v118_v25 = vld [vmem:[#allocation8 + $0x20] sm:$0xff] }
  0x17   :  { %96 = vmatpush.msra.mxu0 %v83_v5  ;;  %v73_v26 = vld [vmem:[#allocation6 + $0x8] sm:$0xff]  ;;  %v117_v27 = vld [vmem:[#allocation8 + $0x18] sm:$0xff]  ;;  %v72_v28 = vld [vmem:[#allocation6] sm:$0xff] }
  0x18   :  { %134 = vmatpush.msra.mxu1 %v125_v11  ;;  %v71_v29 = vld [vmem:[#allocation3] sm:$0xff]  ;;  %v116_v30 = vld [vmem:[#allocation8 + $0x10] sm:$0xff]  ;;  %v115_v31 = vld [vmem:[#allocation8 + $0x8] sm:$0xff] }
  0x19   :  { %97 = vmatpush.msra.mxu0 %v82_v8  ;;  %v114_v32 = vld [vmem:[#allocation8] sm:$0xff]  ;;  %v186_v33 = vld [vmem:[%s346_s2] ss:$0 sm:$0xff] }
  0x1a   :  { %135 = vmatpush.msra.mxu1 %v124_v13  ;;  %v187_v37 = vld [vmem:[%s348_s4] ss:$0 sm:$0xff] }
  0x1b   :  { %98 = vmatpush.msra.mxu0 %v81_v10 }
  0x1c   :  { %136 = vmatpush.msra.mxu1 %v123_v15 }
  0x1d   :  { %99 = vmatpush.msra.mxu0 %v80_v12 }
  0x1e   :  { %137 = vmatpush.msra.mxu1 %v122_v17 }
  0x1f   :  { %100 = vmatpush.msra.mxu0 %v79_v14 }
  0x20   :  { %138 = vmatpush.msra.mxu1 %v121_v19 }
  0x21   :  { %101 = vmatpush.msra.mxu0 %v78_v16 }
  0x22   :  { %139 = vmatpush.msra.mxu1 %v120_v21 }
  0x23   :  { %102 = vmatpush.msra.mxu0 %v77_v18 }
  0x24   :  { %140 = vmatpush.msra.mxu1 %v119_v23 }
  0x25   :  { %103 = vmatpush.msra.mxu0 %v76_v20 }
  0x26   :  { %141 = vmatpush.msra.mxu1 %v118_v25 }
  0x27   :  { %104 = vmatpush.msra.mxu0 %v75_v22 }
  0x28   :  { %142 = vmatpush.msra.mxu1 %v117_v27 }
  0x29   :  { %105 = vmatpush.msra.mxu0 %v74_v24 }
  0x2a   :  { %143 = vmatpush.msra.mxu1 %v116_v30 }
  0x2b   :  { %106 = vmatpush.msra.mxu0 %v73_v26 }
  0x2c   :  { %144 = vmatpush.msra.mxu1 %v115_v31 }
  0x2d   :  { %107 = vmatpush.msra.mxu0 %v72_v28 }
  0x2e   :  { %108 = vmatmul.f32.vlgmr.msra.gmra.mxu0 %v71_v29  ;;  %145 = vmatpush.msra.mxu1 %v114_v32 }
  0xab   :  { %v109_v34 = vpop.f32.mrf.mxu0 }
  0xac   :  { %v110_v35 = vadd.f32 %v186_v33, %v109_v34 }
  0xae   :  { %v112_v36 = vmax.f32 %v110_v35, 0.0 }
  0xb0   :  { %146 = vmatmul.f32.vlgmr.msra.gmra.mxu1 %v112_v36 }
 0x12d   :  { %v147_v38 = vpop.f32.mrf.mxu1 }
 0x12e   :  { %v160_v39 = vadd.f32 %v187_v37, %v147_v38 }
 0x130   :  { %161 = vst [vmem:[#allocation9] sm:$0xff] %v160_v39 }
 0x131   :  { %172 = dma.vmem_to_hbm [thread:$0]  %s168_s12, 128, %s170_s15, [#allocation5]  }
 0x132   :  { %288 = dma.done.wait [#allocation5], 128  }
 0x133   :  { %289 = vsyncadd [#allocation5], 4294967168 }
 0x134   :  { %177 = vsyncpa [#allocation4], 1 }
 0x135   :  { %178 = vsyncpa [#allocation7], 1 }
 0x136   :  { %179 = vsyncpa [#allocation5], 1 }

</bundles_post_ra>
